<compile_context>
chip_gen: v5e
topology: v5e:2x2
jax: 0.10.0
libtpu: 0.0.40
codegen_flags: <defaults>
</compile_context>

<pallas_src>
import functools
import math

import jax
import jax.numpy as jnp
from jax.experimental import pallas as pl
from jax.experimental.pallas import tpu as pltpu


# ---------------------------------------------------------------------------
# Kernels
# ---------------------------------------------------------------------------

def _rmsnorm_kernel(x_ref, o_ref, *, scale, eps_scaled, approx, fast_out):
    xf = x_ref[...].astype(jnp.float32)
    norm = jnp.sqrt(jnp.sum(xf * xf, axis=-1, keepdims=True))
    # Folded: x/(norm/sqrt(d)+eps) == x * sqrt(d) * rcp(norm + eps*sqrt(d)).
    inv = pl.reciprocal(norm + jnp.float32(eps_scaled), approx=approx)
    inv = inv * jnp.float32(scale)                     # (rows, 1)
    if fast_out:
        o_ref[...] = (x_ref[...] * inv.astype(o_ref.dtype)).astype(o_ref.dtype)
    else:
        o_ref[...] = (xf * inv).astype(o_ref.dtype)


def _rmsnorm_kernel_w(x_ref, w_ref, o_ref, *, scale, eps_scaled, approx, fast_out):
    xf = x_ref[...].astype(jnp.float32)
    norm = jnp.sqrt(jnp.sum(xf * xf, axis=-1, keepdims=True))
    inv = pl.reciprocal(norm + jnp.float32(eps_scaled), approx=approx)
    inv = inv * jnp.float32(scale)
    if fast_out:
        o_ref[...] = ((x_ref[...] * inv.astype(o_ref.dtype)) * w_ref[...]
                      ).astype(o_ref.dtype)
    else:
        o_ref[...] = ((xf * inv) * w_ref[...]).astype(o_ref.dtype)


def _rmsnorm_kernel_wb(x_ref, w_ref, b_ref, o_ref, *, scale, eps_scaled, approx,
                       fast_out):
    xf = x_ref[...].astype(jnp.float32)
    norm = jnp.sqrt(jnp.sum(xf * xf, axis=-1, keepdims=True))
    inv = pl.reciprocal(norm + jnp.float32(eps_scaled), approx=approx)
    inv = inv * jnp.float32(scale)
    if fast_out:
        o_ref[...] = ((x_ref[...] * inv.astype(o_ref.dtype)) * w_ref[...]
                      + b_ref[...]).astype(o_ref.dtype)
    else:
        o_ref[...] = ((xf * inv) * w_ref[...] + b_ref[...]).astype(o_ref.dtype)


# ---------------------------------------------------------------------------
# Tile sizing helpers
# ---------------------------------------------------------------------------

def _round_up(x, m):
    return (x + m - 1) // m * m


def _vmem_capacity_bytes():
    try:
        return int(pltpu.get_tpu_info().vmem_capacity_bytes)
    except Exception:
        return 64 * 1024 * 1024  # conservative fallback (v7x per-TC size)


def _choose_row_tile(rows, dim, in_item, out_item, vmem_limit, requested=None):
    """Pick a row tile (multiple of 8) sized against the VMEM budget."""
    rows8 = _round_up(rows, 8)
    if requested is not None:
        return max(8, min(_round_up(int(requested), 8), rows8))

    # Budget = scoped VMEM limit minus a fixed reserve (params, compiler
    # internal scratch).  per_row already includes the 2x double-buffering of
    # the input and output blocks plus one f32 full-tile compute temporary,
    # so the budget is NOT halved again (previous revision double-counted).
    reserve = 8 * 1024 * 1024
    budget = max(vmem_limit - reserve, 2 * 1024 * 1024)
    per_row = dim * (2 * in_item + 2 * out_item + 4)
    tile = max(8, (budget // per_row) // 8 * 8)
    tile = min(tile, 1024, rows8)   # HBM roofline saturates around 512-1024

    # v7x megacore: keep >= 2 parallel grid steps when that still leaves
    # large (>= 256-row) tiles.  Neutral on v5e/v6e (single TC).
    half = _round_up((rows8 + 1) // 2, 8)
    if half >= 256:
        tile = min(tile, half)
    return tile


# ---------------------------------------------------------------------------
# Public wrapper
# ---------------------------------------------------------------------------

def rmsnorm(x, normalized_shape, *, eps=1e-5, weight=None, bias=None,
            row_tile=None, approx_reciprocal=True, fast_low_precision=False):
    """Pallas RMSNorm. `normalized_shape` must match the trailing dims of x.

    approx_reciprocal=True uses the EUP reciprocal (rel err ~2^-12); pass
    False for tight parity with the PyTorch divide.
    fast_low_precision=True does the scale/affine multiplies in the input
    dtype for bf16/f16 inputs (v6e/v7x native bf16 VALU); off by default.
    """
    if isinstance(normalized_shape, int):
        normalized_shape = (normalized_shape,)
    normalized_shape = tuple(normalized_shape)
    length = len(normalized_shape)
    assert tuple(x.shape[-length:]) == normalized_shape, "trailing dims mismatch"

    dim = math.prod(normalized_shape)
    lead_shape = x.shape[:-length]
    rows = math.prod(lead_shape) if lead_shape else 1

    in_item = jnp.dtype(x.dtype).itemsize
    out_item = in_item

    vmem_cap = _vmem_capacity_bytes()
    # 75% of per-core VMEM, clamped so v7x (64 MiB/TC) stays at <= 48 MiB
    # even if the query ever reports a per-chip figure.
    vmem_limit = min(int(vmem_cap * 0.75), 96 * 1024 * 1024)

    tile = _choose_row_tile(rows, dim, in_item, out_item, vmem_limit,
                            requested=row_tile)
    grid = (pl.cdiv(rows, tile),)   # last block may be partial (masked writes)

    x2d = x.reshape(rows, dim)
    row_spec = pl.BlockSpec((tile, dim), lambda i: (i, 0))
    param_spec = pl.BlockSpec((1, dim), lambda i: (0, 0))

    low_prec = bool(fast_low_precision) and jnp.dtype(x.dtype) in (
        jnp.dtype(jnp.bfloat16), jnp.dtype(jnp.float16))
    param_dtype = x.dtype if low_prec else jnp.float32

    sqrt_dim = float(math.sqrt(dim))
    kw = dict(scale=sqrt_dim, eps_scaled=float(eps) * sqrt_dim,
              approx=approx_reciprocal, fast_out=low_prec)

    param_bytes = 0
    if weight is None:
        kernel = functools.partial(_rmsnorm_kernel, **kw)
        in_specs = [row_spec]
        args = (x2d,)
    elif bias is None:
        # Weight-only affine: no synthetic zero bias is materialized/added.
        w2d = weight.reshape(1, dim).astype(param_dtype)
        param_bytes = dim * jnp.dtype(param_dtype).itemsize
        kernel = functools.partial(_rmsnorm_kernel_w, **kw)
        in_specs = [row_spec, param_spec]
        args = (x2d, w2d)
    else:
        w2d = weight.reshape(1, dim).astype(param_dtype)
        b2d = bias.reshape(1, dim).astype(param_dtype)
        param_bytes = 2 * dim * jnp.dtype(param_dtype).itemsize
        kernel = functools.partial(_rmsnorm_kernel_wb, **kw)
        in_specs = [row_spec, param_spec, param_spec]
        args = (x2d, w2d, b2d)

    cost = pl.CostEstimate(
        flops=3 * rows * dim,
        transcendentals=2 * rows,
        bytes_accessed=rows * dim * (in_item + out_item) + param_bytes,
    )

    out2d = pl.pallas_call(
        kernel,
        out_shape=jax.ShapeDtypeStruct((rows, dim), x.dtype),
        grid_spec=pltpu.PrefetchScalarGridSpec(
            num_scalar_prefetch=0,
            grid=grid,
            in_specs=in_specs,
            out_specs=row_spec,
        ),
        compiler_params=pltpu.CompilerParams(
            dimension_semantics=("parallel",),
            vmem_limit_bytes=vmem_limit,
        ),
        cost_estimate=cost,
    )(*args)

    return out2d.reshape(x.shape)


def rmsnorm_ref(x, normalized_shape, *, eps=1e-5, weight=None, bias=None):
    """Pure-JAX reference mirroring the PyTorch forward exactly."""
    if isinstance(normalized_shape, int):
        normalized_shape = (normalized_shape,)
    length = len(normalized_shape)
    dims = tuple(range(-length, 0))
    norm = jnp.sqrt(jnp.sum(jnp.square(x.astype(jnp.float32)), axis=dims,
                            keepdims=True))
    frac = math.prod(x.shape[-length:])
    out = x.astype(jnp.float32) / (norm / frac ** 0.5 + eps)
    if weight is not None:
        out = out * weight.astype(jnp.float32)
        if bias is not None:
            out = out + bias.astype(jnp.float32)
    return out.astype(x.dtype)


if __name__ == "__main__":
    key = jax.random.PRNGKey(0)
    B, N, D = 2, 8, 32  # batch, seq (tokens), hidden
    x = jax.random.normal(key, (B, N, D), dtype=jnp.float32)

    # Loosened tolerance for the approximate EUP reciprocal path.
    TOL = dict(atol=5e-3, rtol=5e-3)

    # Default module config: elementwise_affine=False, bias=False, eps=1e-5.
    out = jax.block_until_ready(rmsnorm(x, D, eps=1e-5))
    ref = rmsnorm_ref(x, D, eps=1e-5)
    assert out.shape == x.shape and out.dtype == x.dtype
    assert jnp.allclose(out, ref, **TOL)

    # Exact-divide parity path (approx_reciprocal=False).
    out_exact = jax.block_until_ready(rmsnorm(x, D, eps=1e-5,
                                              approx_reciprocal=False))
    assert jnp.allclose(out_exact, ref, atol=1e-4, rtol=1e-4)

    # elementwise_affine=True with bias.
    w = jnp.full((D,), 1.5, dtype=jnp.float32)
    b = jnp.full((D,), 0.25, dtype=jnp.float32)
    out_wb = jax.block_until_ready(rmsnorm(x, D, eps=1e-5, weight=w, bias=b))
    assert jnp.allclose(out_wb, rmsnorm_ref(x, D, eps=1e-5, weight=w, bias=b), **TOL)

    # Weight-only affine path (no synthetic zero bias inside the kernel).
    out_w = jax.block_until_ready(rmsnorm(x, D, eps=1e-5, weight=w))
    assert jnp.allclose(out_w, rmsnorm_ref(x, D, eps=1e-5, weight=w), **TOL)

    # Rows not a multiple of the tile: exercises the partial-last-block path
    # (grid = cdiv, no wrapper pad/slice).  rows = 14, row_tile = 8 -> grid 2.
    x_odd = jax.random.normal(jax.random.PRNGKey(1), (2, 7, D), dtype=jnp.float32)
    out_odd = jax.block_until_ready(rmsnorm(x_odd, D, eps=1e-5, row_tile=8))
    assert jnp.allclose(out_odd, rmsnorm_ref(x_odd, D, eps=1e-5), **TOL)

    # bf16 input with the low-precision (v6e/v7x) scale/affine path.
    xb = jax.random.normal(jax.random.PRNGKey(2), (B, N, D), dtype=jnp.bfloat16)
    wb16 = jnp.ones((D,), dtype=jnp.bfloat16)
    out_bf = jax.block_until_ready(
        rmsnorm(xb, D, eps=1e-5, weight=wb16, fast_low_precision=True))
    ref_bf = rmsnorm_ref(xb, D, eps=1e-5, weight=wb16)
    assert jnp.allclose(out_bf.astype(jnp.float32), ref_bf.astype(jnp.float32),
                        atol=5e-2, rtol=5e-2)

    print("KERNEL_OK")
</pallas_src>

<mosaic_0001>
module attributes {stable_mosaic.version = 11 : i64} {
  func.func @_rmsnorm_kernel(%arg0: i32, %arg1: memref<16x32xf32, #tpu.memory_space<vmem>>, %arg2: memref<16x32xf32, #tpu.memory_space<vmem>>) attributes {dimension_semantics = [#tpu.dimension_semantics<parallel>], iteration_bounds = array<i64: 1>, scalar_prefetch = 0 : i64, scratch_operands = 0 : i64, tpu.core_type = #tpu.core_type<tc>, window_params = [{transform_indices = @transform_0, window_bounds = array<i64: 16, 32>}, {transform_indices = @transform_1, window_bounds = array<i64: 16, 32>}]} {
    %c0 = arith.constant 0 : index
    %c0_0 = arith.constant 0 : index
    %0 = vector.load %arg1[%c0, %c0_0] : memref<16x32xf32, #tpu.memory_space<vmem>>, vector<16x32xf32>
    %1 = arith.mulf %0, %0 : vector<16x32xf32>
    %cst = arith.constant dense<0.000000e+00> : vector<16xf32>
    %2 = vector.multi_reduction <add>, %1, %cst [1] : vector<16x32xf32> to vector<16xf32>
    %3 = vector.shape_cast %2 : vector<16xf32> to vector<16x1xf32>
    %4 = math.sqrt %3 : vector<16x1xf32>
    %cst_1 = arith.constant 5.65685441E-5 : f32
    %5 = vector.broadcast %cst_1 : f32 to vector<16x1xf32>
    %6 = arith.addf %4, %5 : vector<16x1xf32>
    %7 = tpu.reciprocal %6 {approx = true} : vector<16x1xf32> -> vector<16x1xf32>
    %cst_2 = arith.constant 5.65685415 : f32
    %8 = vector.broadcast %cst_2 : f32 to vector<16x1xf32>
    %9 = arith.mulf %7, %8 : vector<16x1xf32>
    %10 = vector.broadcast %9 : vector<16x1xf32> to vector<16x32xf32>
    %11 = arith.mulf %0, %10 : vector<16x32xf32>
    %c0_3 = arith.constant 0 : index
    %c0_4 = arith.constant 0 : index
    %12 = vector.load %arg2[%c0_3, %c0_4] : memref<16x32xf32, #tpu.memory_space<vmem>>, vector<16x32xf32>
    tpu.vector_store %arg2[%c0_3, %c0_4], %11 {strides = array<i32>} : memref<16x32xf32, #tpu.memory_space<vmem>>, vector<16x32xf32>,
    return
  }
  func.func @transform_0(%arg0: i32) -> (i32, i32) {
    %c0_i32 = arith.constant 0 : i32
    %c0_i32_0 = arith.constant 0 : i32
    return %arg0, %c0_i32 : i32, i32
  }
  func.func @transform_1(%arg0: i32) -> (i32, i32) {
    %c0_i32 = arith.constant 0 : i32
    %c0_i32_0 = arith.constant 0 : i32
    return %arg0, %c0_i32 : i32, i32
  }
}

</mosaic_0001>

<bundles_post_ra>
// kernel: tpu_custom_call.1
= control target key start
LH: loop header
LB: loop body
LE: loop exit
PB: predicated region body
PF: predicated region fallthrough
CT: control target
= control target key end

     0   :  { %6 = vsyncpa [#allocation3], 0  ;;  %s183_s0 = inlined_call_operand.hbm [shape: f32[16,32], index: 0, kind: input, shape index: {}]   ;;  %s184_s1 = inlined_call_operand.hbm [shape: f32[16,32], index: 1, kind: output, shape index: {}]  }
   0x1   :  { %7 = vsyncpa [#allocation4], 0  ;;  %s12_s8 = sshll.u32 %s183_s0, 4  ;;  %s153_s9 = smov [#allocation2]   ;;  %s13_s8 = int_to_ptr.hbm [resolvable:$true] %s12_s8 }
   0x2   :  { %s14_s10 = sshll.u32 %s153_s9, 4  ;;  %s154_s11 = smov 128   ;;  %s15_s10 = int_to_ptr.vmem [resolvable:$true] %s14_s10 }
   0x3   :  { %s155_s12 = smov 8  }
   0x4   :  { %20 = dma.hbm_to_vmem [thread:$0]  %s13_s8, 256, %s15_s10, [#allocation3], %s154_s11, %s154_s11, %s155_s12  }
   0x5   :  { %149 = dma.done.wait [#allocation3], 256  }
   0x6   :  { %150 = vsyncadd [#allocation3], 4294967040  ;;  %v25_v0 = vld [vmem:[#allocation2] sm:$0xff]  ;;  %vm29_vm0 = vcmask 261120   ;;  %v26_v2 = vld [vmem:[#allocation2 + $0x8] sm:$0xff]  ;;  %s156_s0 = smov [#allocation5]  }
   0x7   :  { %v27_v1 = vmul.f32 %v25_v0, %v25_v0  ;;  %v28_v4 = vmul.f32 %v26_v2, %v26_v2  ;;  %s74_s13 = sshll.u32 %s156_s0, 4  ;;  %s76_s16 = sshll.u32 %s184_s1, 4  ;;  %s75_s13 = int_to_ptr.vmem [resolvable:$true] %s74_s13  ;;  %s77_s16 = int_to_ptr.hbm [resolvable:$true] %s76_s16 }
   0x9   :  { %v30_v3 = vsel %vm29_vm0, %v27_v1, 0.0  ;;  %v33_v5 = vsel %vm29_vm0, %v28_v4, 0.0 }
   0xa   :  { %31 = vadd.xlane.f32.xlu0 %v30_v3 }
  0x12   :  { %34 = vadd.xlane.f32.xlu0 %v33_v5 }
  0x7d   :  { %v32_v6 = vpop.xlane.xlu0 %31 }
  0x7e   :  { %93 = vrsqrt.f32 %v32_v6  ;;  %vm43_vm1 = vcmp.eq.f32.partialorder %v32_v6, inf  ;;  %v46_v18 = vand.u32 2147483648, %v32_v6  ;;  %vm45_vm2 = vcmp.eq.f32.partialorder %v32_v6, 0.0 }
  0x84   :  { %v94_v7 = vpop.eup %93 }
  0x85   :  { %v37_v8 = vmul.f32 %v94_v7, %v32_v6  ;;  %v35_v9 = vpop.xlane.xlu0 %34 }
  0x86   :  { %95 = vrsqrt.f32 %v35_v9  ;;  %vm55_vm3 = vcmp.eq.f32.partialorder %v35_v9, inf  ;;  %v58_v26 = vand.u32 2147483648, %v35_v9  ;;  %vm57_vm4 = vcmp.eq.f32.partialorder %v35_v9, 0.0 }
  0x87   :  { %v38_v10 = vmul.f32 %v94_v7, %v37_v8 }
  0x89   :  { %v39_v11 = vmul.f32 0.5, %v38_v10 }
  0x8b   :  { %v40_v12 = vsub.f32 1.5, %v39_v11 }
  0x8c   :  { %v96_v13 = vpop.eup %95 }
  0x8d   :  { %v41_v14 = vmul.f32 %v94_v7, %v40_v12  ;;  %v49_v15 = vmul.f32 %v96_v13, %v35_v9 }
  0x8f   :  { %v42_v16 = vmul.f32 %v41_v14, %v32_v6  ;;  %v50_v17 = vmul.f32 %v96_v13, %v49_v15 }
  0x91   :  { %v44_v19 = vsel %vm43_vm1, %v32_v6, %v42_v16  ;;  %v51_v20 = vmul.f32 0.5, %v50_v17 }
  0x92   :  { %v47_v21 = vsel %vm45_vm2, %v46_v18, %v44_v19 }
  0x93   :  { %v52_v22 = vsub.f32 1.5, %v51_v20  ;;  %v60_v23 = vadd.f32 5.6568544e-05, %v47_v21 }
  0x95   :  { %v53_v24 = vmul.f32 %v96_v13, %v52_v22  ;;  %97 = vrcp.f32 %v60_v23 }
  0x97   :  { %v54_v25 = vmul.f32 %v53_v24, %v35_v9 }
  0x99   :  { %v56_v27 = vsel %vm55_vm3, %v35_v9, %v54_v25 }
  0x9a   :  { %v59_v28 = vsel %vm57_vm4, %v58_v26, %v56_v27 }
  0x9b   :  { %v98_v29 = vpop.eup %97  ;;  %v61_v30 = vadd.f32 5.6568544e-05, %v59_v28 }
  0x9c   :  { %v64_v31 = vmul.f32 5.656854, %v98_v29 }
  0x9d   :  { %99 = vrcp.f32 %v61_v30 }
  0x9e   :  { %v66_v32 = vmul.f32 %v64_v31, %v25_v0 }
  0xa0   :  { %68 = vst.msk [vmem:[#allocation5] sm:$0xff] %vm29_vm0, %v66_v32 }
  0xa3   :  { %v100_v33 = vpop.eup %99 }
  0xa4   :  { %v65_v34 = vmul.f32 5.656854, %v100_v33 }
  0xa6   :  { %v67_v35 = vmul.f32 %v65_v34, %v26_v2 }
  0xa8   :  { %69 = vst.msk [vmem:[#allocation5 + $0x8] sm:$0xff] %vm29_vm0, %v67_v35 }
  0xa9   :  { %82 = dma.vmem_to_hbm [thread:$0]  %s75_s13, 256, %s77_s16, [#allocation4], %s154_s11, %s154_s11, %s155_s12  }
  0xaa   :  { %151 = dma.done.wait [#allocation4], 256  }
  0xab   :  { %152 = vsyncadd [#allocation4], 4294967040 }
  0xac   :  { %87 = vsyncpa [#allocation3], 1 }
  0xad   :  { %88 = vsyncpa [#allocation4], 1 }

</bundles_post_ra>
